<compile_context>
chip_gen: v5e
topology: v5e:2x2
jax: 0.10.0
libtpu: 0.0.40
codegen_flags: <defaults>
</compile_context>

<pallas_src>
import functools
import math

import jax
import jax.numpy as jnp
import numpy as np
from jax.experimental import pallas as pl
from jax.experimental.pallas import tpu as pltpu


# ---------------------------------------------------------------------------
# Generation-aware tuning.
# ---------------------------------------------------------------------------
def _tpu_tuning():
    kind = ""
    try:
        kind = jax.devices()[0].device_kind.lower()
    except Exception:
        pass
    if "v7" in kind:
        # 64 MiB VMEM: keep 256 tiles so B*nq keeps both TensorCores fed.
        return dict(tq=256, tkv=256, vmem=48 * 1024 * 1024,
                    exp_dtype=jnp.bfloat16)
    if "v6" in kind:
        # 128 MiB VMEM, bf16 EUP: bigger q tiles, bf16 exp.
        return dict(tq=512, tkv=256, vmem=96 * 1024 * 1024,
                    exp_dtype=jnp.bfloat16)
    if "v5" in kind:
        # v5e/v5p: no bf16 EUP path -> keep exp in f32.
        return dict(tq=512, tkv=256, vmem=96 * 1024 * 1024,
                    exp_dtype=jnp.float32)
    return dict(tq=256, tkv=256, vmem=64 * 1024 * 1024,
                exp_dtype=jnp.float32)


def _choose_tile(s, pref):
    """Pick a seq tile (multiple of 8) and the padded length covering s."""
    if s <= pref:
        t = max(8, ((s + 7) // 8) * 8)
        return t, t
    pad = ((s + pref - 1) // pref) * pref
    return pref, pad


# ---------------------------------------------------------------------------
# Projection pre-pass: y = x @ W + b  (bf16 MXU inputs, f32 accumulation).
# ---------------------------------------------------------------------------
def _linear_kernel(x_ref, w_ref, b_ref, o_ref):
    y = jnp.dot(x_ref[0], w_ref[...], preferred_element_type=jnp.float32)
    o_ref[0] = (y + b_ref[...]).astype(o_ref.dtype)


def _linear(x, w, b, tile, vmem_limit):
    B, S, H = x.shape
    Ho = w.shape[1]
    grid = (B, S // tile)
    flops = 2 * B * S * H * Ho
    bytes_accessed = B * S * H * 2 + B * S * Ho * 2 + H * Ho * 2 + Ho * 4
    return pl.pallas_call(
        _linear_kernel,
        out_shape=jax.ShapeDtypeStruct((B, S, Ho), jnp.bfloat16),
        grid_spec=pltpu.PrefetchScalarGridSpec(
            num_scalar_prefetch=0,
            grid=grid,
            in_specs=[pl.BlockSpec((1, tile, H), lambda bi, si: (bi, si, 0)),
                      pl.BlockSpec((H, Ho), lambda bi, si: (0, 0)),
                      pl.BlockSpec((1, Ho), lambda bi, si: (0, 0))],
            out_specs=pl.BlockSpec((1, tile, Ho), lambda bi, si: (bi, si, 0))),
        compiler_params=pltpu.CompilerParams(
            dimension_semantics=("parallel", "parallel"),
            vmem_limit_bytes=vmem_limit),
        cost_estimate=pl.CostEstimate(flops=int(flops), transcendentals=0,
                                      bytes_accessed=int(bytes_accessed)),
    )(x, w, b)


# ---------------------------------------------------------------------------
# Flash attention + output projection on pre-projected, head-split q/k/v.
# ---------------------------------------------------------------------------
def _mha_flash_kernel(q_ref, k_ref, v_ref, wo_ref, bo_ref, o_ref,
                      m_scratch, l_scratch, acc_scratch,
                      *, kv_len, mask_kv, exp_dtype):
    ki = pl.program_id(2)
    nkv = pl.num_programs(2)

    @pl.when(ki == 0)
    def _init():
        m_scratch[...] = jnp.full(m_scratch.shape, -jnp.inf, m_scratch.dtype)
        l_scratch[...] = jnp.zeros(l_scratch.shape, l_scratch.dtype)
        acc_scratch[...] = jnp.zeros(acc_scratch.shape, acc_scratch.dtype)

    q = q_ref[0]                 # (h, tq,  d_k) bf16, pre-scaled by 1/sqrt(d_k)
    k = k_ref[0]                 # (h, tkv, d_k) bf16
    v = v_ref[0]                 # (h, tkv, d_k) bf16

    # Per-head scores for this KV tile, f32 accumulation on the MXU.
    s = jnp.einsum('hqd,hkd->hqk', q, k, preferred_element_type=jnp.float32)

    if mask_kv:
        # Padded tail columns get a large negative score (-> exp underflows).
        col = ki * s.shape[2] + jax.lax.broadcasted_iota(jnp.int32, s.shape, 2)
        s = jnp.where(col < kv_len, s, -1e30)

    # Online (flash) softmax update; m/alpha math stays f32, exp may be bf16.
    m_prev = m_scratch[...]
    m_new = jnp.maximum(m_prev, jnp.max(s, axis=-1, keepdims=True))
    alpha = jnp.exp(m_prev - m_new)
    p = jnp.exp((s - m_new).astype(exp_dtype))
    l_scratch[...] = alpha * l_scratch[...] + jnp.sum(
        p, axis=-1, keepdims=True, dtype=jnp.float32)
    acc_scratch[...] = alpha * acc_scratch[...] + jnp.einsum(
        'hqk,hkd->hqd', p.astype(jnp.bfloat16), v,
        preferred_element_type=jnp.float32)
    m_scratch[...] = m_new

    @pl.when(ki == nkv - 1)
    def _finalize():
        # Normalize and project out, contracting (h, d_k) against wo viewed as
        # (h, d_k, H) via per-head 2-D dots: no head-merge transpose/reshape.
        ctx = (acc_scratch[...] * pl.reciprocal(l_scratch[...], approx=True)
               ).astype(jnp.bfloat16)                      # (h, tq, d_k)
        nh = wo_ref.shape[0]
        out = jnp.dot(ctx[0], wo_ref[0], preferred_element_type=jnp.float32)
        for h_i in range(1, nh):
            out = out + jnp.dot(ctx[h_i], wo_ref[h_i],
                                preferred_element_type=jnp.float32)
        o_ref[0] = (out + bo_ref[...]).astype(o_ref.dtype)


# ---------------------------------------------------------------------------
# Wrapper.
# ---------------------------------------------------------------------------
def multi_head_attention(query, key, value, params, num_heads):
    """query/key/value: [B, S, H] float32.  params: dict of weights/biases.

    Weights are stored [in, out] (transposed vs. nn.Linear), biases [1, H].
    """
    B, Sq, H = query.shape
    Skv = key.shape[1]
    d_k = H // num_heads

    tune = _tpu_tuning()
    tq, sq_pad = _choose_tile(Sq, tune['tq'])
    tkv, skv_pad = _choose_tile(Skv, tune['tkv'])
    vmem = tune['vmem']

    scale = 1.0 / math.sqrt(d_k)

    qh = query.astype(jnp.bfloat16)
    kh = key.astype(jnp.bfloat16)
    vh = value.astype(jnp.bfloat16)
    if sq_pad != Sq:
        qh = jnp.pad(qh, ((0, 0), (0, sq_pad - Sq), (0, 0)))
    if skv_pad != Skv:
        kh = jnp.pad(kh, ((0, 0), (0, skv_pad - Skv), (0, 0)))
        vh = jnp.pad(vh, ((0, 0), (0, skv_pad - Skv), (0, 0)))

    # Fold 1/sqrt(d_k) into the Q projection (weights AND bias).
    wq = (params['wq'] * scale).astype(jnp.bfloat16)
    bq = (params['bq'] * scale).astype(jnp.float32)
    wk = params['wk'].astype(jnp.bfloat16)
    bk = params['bk'].astype(jnp.float32)
    wv = params['wv'].astype(jnp.bfloat16)
    bv = params['bv'].astype(jnp.float32)
    # wo viewed as (h, d_k, H): rows of wo are ordered head-major then d.
    wo3 = params['wo'].reshape(num_heads, d_k, H).astype(jnp.bfloat16)
    bo = params['bo'].astype(jnp.float32)

    # --- Hoisted projection pre-pass (one pass per tensor, never recomputed).
    qp = _linear(qh, wq, bq, tq, vmem)           # (B, sq_pad,  H) bf16
    kp = _linear(kh, wk, bk, tkv, vmem)          # (B, skv_pad, H) bf16
    vp = _linear(vh, wv, bv, tkv, vmem)

    # --- Head split once (outside the flash loop).
    q4 = qp.reshape(B, sq_pad, num_heads, d_k).transpose(0, 2, 1, 3)
    k4 = kp.reshape(B, skv_pad, num_heads, d_k).transpose(0, 2, 1, 3)
    v4 = vp.reshape(B, skv_pad, num_heads, d_k).transpose(0, 2, 1, 3)

    nq = sq_pad // tq
    nkv = skv_pad // tkv
    grid = (B, nq, nkv)

    q_spec = pl.BlockSpec((1, num_heads, tq, d_k), lambda b, qi, ki: (b, 0, qi, 0))
    kv_spec = pl.BlockSpec((1, num_heads, tkv, d_k), lambda b, qi, ki: (b, 0, ki, 0))
    wo_spec = pl.BlockSpec((num_heads, d_k, H), lambda b, qi, ki: (0, 0, 0))
    bo_spec = pl.BlockSpec((1, H), lambda b, qi, ki: (0, 0))
    out_spec = pl.BlockSpec((1, tq, H), lambda b, qi, ki: (b, qi, 0))

    kernel = functools.partial(
        _mha_flash_kernel,
        kv_len=Skv,
        mask_kv=(skv_pad != Skv),
        exp_dtype=tune['exp_dtype'])

    flops = (2 * B * sq_pad * skv_pad * H          # Q K^T
             + 2 * B * sq_pad * skv_pad * H        # P V
             + 2 * B * sq_pad * H * H)             # output projection
    transcendentals = B * num_heads * sq_pad * skv_pad
    bytes_accessed = (B * sq_pad * H * 2                  # q (bf16)
                      + 2 * B * skv_pad * H * 2 * nq      # k, v re-read per q-tile
                      + B * sq_pad * H * 4                # out (f32)
                      + num_heads * d_k * H * 2 + H * 4)  # wo + bo
    cost = pl.CostEstimate(flops=int(flops),
                           transcendentals=int(transcendentals),
                           bytes_accessed=int(bytes_accessed))

    out = pl.pallas_call(
        kernel,
        out_shape=jax.ShapeDtypeStruct((B, sq_pad, H), query.dtype),
        grid_spec=pltpu.PrefetchScalarGridSpec(
            num_scalar_prefetch=0,
            grid=grid,
            in_specs=[q_spec, kv_spec, kv_spec, wo_spec, bo_spec],
            out_specs=out_spec,
            scratch_shapes=[
                pltpu.VMEM((num_heads, tq, 1), jnp.float32),    # running max
                pltpu.VMEM((num_heads, tq, 1), jnp.float32),    # running sum
                pltpu.VMEM((num_heads, tq, d_k), jnp.float32),  # acc context
            ]),
        compiler_params=pltpu.CompilerParams(
            dimension_semantics=("parallel", "parallel", "arbitrary"),
            vmem_limit_bytes=vmem),
        cost_estimate=cost,
    )(q4, k4, v4, wo3, bo)

    if sq_pad != Sq:
        out = out[:, :Sq, :]
    return out


# ---------------------------------------------------------------------------
# Pure-JAX reference mirroring the PyTorch forward (mask=None, eval mode).
# ---------------------------------------------------------------------------
def _reference(query, key, value, params, num_heads):
    B, S, H = query.shape
    d_k = H // num_heads
    q = query @ params['wq'] + params['bq'][0]
    k = key @ params['wk'] + params['bk'][0]
    v = value @ params['wv'] + params['bv'][0]
    q = q.reshape(B, S, num_heads, d_k).transpose(0, 2, 1, 3)
    k = k.reshape(B, S, num_heads, d_k).transpose(0, 2, 3, 1)
    v = v.reshape(B, S, num_heads, d_k).transpose(0, 2, 1, 3)
    scores = (q @ k) / np.sqrt(d_k)
    probs = jax.nn.softmax(scores, axis=-1)
    y = probs @ v
    y = y.transpose(0, 2, 1, 3).reshape(B, S, H)
    return y @ params['wo'] + params['bo'][0]


if __name__ == "__main__":
    # Small shapes consistent with the module: batch=2, seq=8, hidden=32, heads=4.
    B, S, H = 2, 8, 32
    num_heads = 4

    key0 = jax.random.PRNGKey(0)
    keys = jax.random.split(key0, 12)

    def init_linear(kw, kb, fan_in, fan_out):
        bound = 1.0 / np.sqrt(fan_in)
        w = jax.random.uniform(kw, (fan_in, fan_out), jnp.float32, -bound, bound)
        b = jax.random.uniform(kb, (1, fan_out), jnp.float32, -bound, bound)
        return w, b

    wq, bq = init_linear(keys[0], keys[1], H, H)
    wk, bk = init_linear(keys[2], keys[3], H, H)
    wv, bv = init_linear(keys[4], keys[5], H, H)
    wo, bo = init_linear(keys[6], keys[7], H, H)
    params = dict(wq=wq, bq=bq, wk=wk, bk=bk, wv=wv, bv=bv, wo=wo, bo=bo)

    query = jax.random.normal(keys[8], (B, S, H), jnp.float32)
    key_in = jax.random.normal(keys[9], (B, S, H), jnp.float32)
    value = jax.random.normal(keys[10], (B, S, H), jnp.float32)

    out = multi_head_attention(query, key_in, value, params, num_heads)
    out = jax.block_until_ready(out)

    ref = _reference(query, key_in, value, params, num_heads)
    assert out.shape == (B, S, H)
    # Tolerance loosened for bf16 matmul inputs / bf16 exp (f32 accumulation).
    np.testing.assert_allclose(np.asarray(out), np.asarray(ref),
                               rtol=3e-2, atol=3e-2)
    print("KERNEL_OK")
</pallas_src>

<mosaic_0001>
module attributes {stable_mosaic.version = 11 : i64} {
  func.func @_linear_kernel(%arg0: i32, %arg1: i32, %arg2: memref<1x8x32xbf16, #tpu.memory_space<vmem>>, %arg3: memref<32x32xbf16, #tpu.memory_space<vmem>>, %arg4: memref<1x32xf32, #tpu.memory_space<vmem>>, %arg5: memref<1x8x32xbf16, #tpu.memory_space<vmem>>) attributes {dimension_semantics = [#tpu.dimension_semantics<parallel>, #tpu.dimension_semantics<parallel>], iteration_bounds = array<i64: 2, 1>, scalar_prefetch = 0 : i64, scratch_operands = 0 : i64, tpu.core_type = #tpu.core_type<tc>, window_params = [{transform_indices = @transform_0, window_bounds = array<i64: 1, 8, 32>}, {pipeline_mode = #tpu.pipeline_mode<synchronous>, transform_indices = @transform_1, window_bounds = array<i64: 32, 32>}, {pipeline_mode = #tpu.pipeline_mode<synchronous>, transform_indices = @transform_2, window_bounds = array<i64: 1, 32>}, {transform_indices = @transform_3, window_bounds = array<i64: 1, 8, 32>}]} {
    %c0 = arith.constant 0 : index
    %c0_0 = arith.constant 0 : index
    %c0_1 = arith.constant 0 : index
    %0 = vector.load %arg2[%c0, %c0_0, %c0_1] : memref<1x8x32xbf16, #tpu.memory_space<vmem>>, vector<1x8x32xbf16>
    %1 = vector.shape_cast %0 : vector<1x8x32xbf16> to vector<8x32xbf16>
    %c0_2 = arith.constant 0 : index
    %c0_3 = arith.constant 0 : index
    %2 = vector.load %arg3[%c0_2, %c0_3] : memref<32x32xbf16, #tpu.memory_space<vmem>>, vector<32x32xbf16>
    %cst = arith.constant dense<0.000000e+00> : vector<8x32xf32>
    %3 = tpu.matmul %1, %2, %cst {dimension_numbers = #tpu.dot_dimension_numbers<[1], [0], [0], [1], [0, 0, 1, 1], [], []>} : vector<8x32xbf16>, vector<32x32xbf16>, vector<8x32xf32> -> vector<8x32xf32>
    %c0_4 = arith.constant 0 : index
    %c0_5 = arith.constant 0 : index
    %4 = vector.load %arg4[%c0_4, %c0_5] : memref<1x32xf32, #tpu.memory_space<vmem>>, vector<1x32xf32>
    %5 = vector.broadcast %4 : vector<1x32xf32> to vector<8x32xf32>
    %6 = arith.addf %3, %5 : vector<8x32xf32>
    %7 = arith.truncf %6 : vector<8x32xf32> to vector<8x32xbf16>
    %c0_6 = arith.constant 0 : index
    %c0_7 = arith.constant 0 : index
    %c0_8 = arith.constant 0 : index
    %8 = vector.load %arg5[%c0_6, %c0_7, %c0_8] : memref<1x8x32xbf16, #tpu.memory_space<vmem>>, vector<1x8x32xbf16>
    %9 = vector.shape_cast %8 : vector<1x8x32xbf16> to vector<8x32xbf16>
    %10 = vector.shape_cast %7 : vector<8x32xbf16> to vector<1x8x32xbf16>
    tpu.vector_store %arg5[%c0_6, %c0_7, %c0_8], %10 {strides = array<i32>} : memref<1x8x32xbf16, #tpu.memory_space<vmem>>, vector<1x8x32xbf16>,
    return
  }
  func.func @transform_0(%arg0: i32, %arg1: i32) -> (i32, i32, i32) {
    %c0_i32 = arith.constant 0 : i32
    %c0_i32_0 = arith.constant 0 : i32
    return %arg0, %arg1, %c0_i32 : i32, i32, i32
  }
  func.func @transform_1(%arg0: i32, %arg1: i32) -> (i32, i32) {
    %c0_i32 = arith.constant 0 : i32
    %c0_i32_0 = arith.constant 0 : i32
    %c0_i32_1 = arith.constant 0 : i32
    return %c0_i32, %c0_i32_0 : i32, i32
  }
  func.func @transform_2(%arg0: i32, %arg1: i32) -> (i32, i32) {
    %c0_i32 = arith.constant 0 : i32
    %c0_i32_0 = arith.constant 0 : i32
    %c0_i32_1 = arith.constant 0 : i32
    return %c0_i32, %c0_i32_0 : i32, i32
  }
  func.func @transform_3(%arg0: i32, %arg1: i32) -> (i32, i32, i32) {
    %c0_i32 = arith.constant 0 : i32
    %c0_i32_0 = arith.constant 0 : i32
    return %arg0, %arg1, %c0_i32 : i32, i32, i32
  }
}

</mosaic_0001>

<bundles_post_ra>
// kernel: tpu_custom_call.1
= control target key start
LH: loop header
LB: loop body
LE: loop exit
PB: predicated region body
PF: predicated region fallthrough
CT: control target
= control target key end

     0   :  { %8 = vsyncpa [#allocation3], 0  ;;  %s790_s0 = inlined_call_operand.hbm [shape: bf16[2,8,32], index: 0, kind: input, shape index: {}]   ;;  %s791_s1 = inlined_call_operand.hbm [shape: bf16[32,32], index: 1, kind: input, shape index: {}]   ;;  %s792_s2 = inlined_call_operand.vmem [shape: f32[1,32], index: 2, kind: input, shape index: {}]   ;;  %s793_s3 = inlined_call_operand.hbm [shape: bf16[2,8,32], index: 3, kind: output, shape index: {}]  }
   0x1   :  { %10 = vsyncpa [#allocation3 + $0x1], 0 }
   0x2   :  { %11 = vsyncpa [#allocation6], 0 }
   0x3   :  { %12 = vsyncpa [#allocation4], 0 }
   0x4   :  { %14 = vsyncpa [#allocation4 + $0x1], 0  ;;  %s644_s12 = smov 0   ;;  %s646_s13 = smov 0  }
   0x5   :  { %s648_s14 = smov 0   ;;  %s650_s15 = smov 0  }
   0x6   :  { %s652_s16 = smov 0   ;;  %s654_s17 = smov 0  }
   0x7 LB: > { %s371_s18 = sadd.s32 4294967295, %s619_s17   ;;  %p373_p0 = scmp.ge.s32.totalorder %s619_s17, 1  ;;  %s619_s17 = sphi %s654_s17, %s20_s17   ;;  %s615_s16 = sphi %s652_s16, %s804_s16   ;;  %s611_s15 = sphi %s650_s15, %s803_s15   ;;  %s607_s14 = sphi %s648_s14, %s802_s14   ;;  %s603_s13 = sphi %s646_s13, %s801_s13   ;;  %s599_s12 = sphi %s644_s12, %s800_s12  }
   0x8   : > { %p676_p1 = scmp.eq.s32.totalorder %s371_s18, 0  ;;  %p135_p2 = scmp.lt.s32.totalorder %s619_s17, 3 }
   0x9   : > { %s146_s22 = sshll.u32 %s791_s1, 4  ;;  %s621_s24 = smov [#allocation5]   ;;  %s147_s22 = int_to_ptr.hbm [resolvable:$true] %s146_s22 }
   0xa   : > { %p684_p3 = pnand %p373_p0, %p135_p2  ;;  %s148_s25 = sshll.u32 %s621_s24, 4  ;;  %s149_s25 = int_to_ptr.vmem [resolvable:$true] %s148_s25 }
   0xb   : > { %p375_p6 = scmp.ge.s32.totalorder %s619_s17, 2  ;;  %s622_s26 = smov 64  }
   0xc   : > { %p405_p4 = pneg %p684_p3  ;;  %s623_s27 = smov 4  }
   0xd   : > { %s372_s28 = sadd.s32 4294967294, %s619_s17   ;;  %s32_s29 = sadd.s32 1, %s615_s16 }
   0xe   : > { %p406_p5 = pnand %p405_p4, %p676_p1  ;;  %s41_s30 = sadd.s32 1, %s607_s14 }
   0xf   : > { %p34_p7 = scmp.ge.s32.totalorder %s32_s29, 2  ;;  %p48_p8 = scmp.ne.s32.totalorder %s607_s14, %s603_s13 }
  0x10   : > { %408 = dma.hbm_to_vmem [thread:$0]  (!%p406_p5), %s147_s22, 256, %s149_s25, [#allocation6], %s622_s26, %s622_s26, %s623_s27  }
  0x11   : > { %p49_p9 = scmp.eq.s32.totalorder %s619_s17, 0  ;;  %p54_p10 = scmp.ne.s32.totalorder %s603_s13, %s599_s12 }
  0x12   : > { %s806_s29 = smov (%p34_p7, %s32_s29), 0  ;;  %p122_p13 = scmp.eq.s32.totalorder %s371_s18, 1 }
  0x13   : > { %p703_p11 = por %p49_p9, %p48_p8  ;;  %p709_p12 = por %p676_p1, %p54_p10 }
  0x14   : > { %s36_s6 = ssub.s32 %s615_s16, %s806_s29  ;;  %p128_p2 = scmp.eq.s32.totalorder %s372_s28, 1 }
  0x15   : > { %p39_p0 = scmp.eq.s32.totalorder %s36_s6, 0  ;;  %p715_p4 = por %p122_p13, %p48_p8 }
  0x16   : > { %p418_p5 = scmp.lt.s32.totalorder %s619_s17, 2  ;;  %p723_p7 = por %p128_p2, %p54_p10 }
  0x17   : > { %s721_s8 = scalar_select %p39_p0, %s607_s14, %s41_s30  }
  0x18   : > { %s165_s10 = sand.u32 1, %s607_s14   ;;  %s377_s20 = sshll.u32 %s615_s16, 2 }
  0x19   : > { %s376_s11 = sshll.u32 %s165_s10, 2  ;;  %s174_s18 = scalar_lea.hbm %s790_s0, %s377_s20 }
  0x1a   : > { %s169_s24 = scalar_lea.vmem [#allocation2], %s376_s11  ;;  %s176_s26 = sshll.u32 %s174_s18, 4  ;;  %s177_s26 = int_to_ptr.hbm [resolvable:$true] %s176_s26 }
  0x1b   : > { %s178_s25 = sshll.u32 %s169_s24, 4  ;;  %p410_p8 = pnand %p418_p5, %p703_p11  ;;  %s179_s25 = int_to_ptr.vmem [resolvable:$true] %s178_s25 }
  0x1c   : > { %s166_s27 = scalar_lea.sflag [#allocation3], %s165_s10  ;;  %187 = sbr.rel (%p684_p3) target bundleno = 178 (0xb2), region = 32 }
  0x1d   : > { %412 = dma.hbm_to_vmem [thread:$0]  (!%p410_p8), %s177_s26, 64, %s179_s25, %s166_s27  }
  0x1e   : > { %s737_s28 = sand.u32 (!%p684_p3), 1, %s603_s13  }
  0x1f   : > { %s379_s30 = sshll.u32 (!%p684_p3), %s737_s28, 2  ;;  %s190_s6 = scalar_lea.sflag (!%p684_p3), [#allocation3], %s737_s28 }
  0x20   : > { %s193_s11 = scalar_lea.vmem (!%p684_p3), [#allocation2], %s379_s30 }
  0x21   : > { %586 = dma.done.wait (%p709_p12), %s190_s6, 64  }
  0x22   : > { %588 = vsyncadd (%p709_p12), %s190_s6, 4294967232 }
  0x23   : > { %590 = dma.done.wait (%p676_p1), [#allocation6], 256  }
  0x24   : > { %592 = vsyncadd (%p676_p1), [#allocation6], 4294967040  ;;  %v396_v0 = vld [vmem:[#allocation5 + $0x8] sm:$0xff]  ;;  %v395_v1 = vld [vmem:[#allocation5] sm:$0xff]  ;;  %vm244_vm0 = vcmask 261120   ;;  %s392_s23 = sshll.u32 %s611_s15, 2 }
  0x25   : > { %254 = vmatpush.bf16.msra.mxu0 %v396_v0  ;;  %v223_v2 = vld [vmem:[%s193_s11] sm:$0xf]  ;;  %s276_s21 = scalar_lea.hbm %s793_s3, %s392_s23  ;;  %s221_s19 = scalar_lea.vmem [#allocation7], %s379_s30  ;;  %vm262_vm1 = vcmask 257024  }
  0x26   : > { %v472_v3 = vld [vmem:[%s792_s2] ss:$0 sm:$0xff]  ;;  %s278_s22 = sshll.u32 %s221_s19, 4  ;;  %s280_s18 = sshll.u32 %s276_s21, 4  ;;  %s279_s22 = int_to_ptr.vmem [resolvable:$true] %s278_s22  ;;  %s281_s18 = int_to_ptr.hbm [resolvable:$true] %s280_s18 }
  0x27   : > { %s265_s15 = scalar_lea.sflag [#allocation4], %s737_s28  ;;  %s547_s24 = sshra.s32 %s281_s18, 4  ;;  %s548_s24 = int_to_ptr.hbm [resolvable:$true] %s547_s24 }
  0x28   : > { %s549_s25 = scalar_lea.hbm %s548_s24, 4  ;;  %s553_s30 = scalar_lea.hbm %s793_s3, 8 }
  0x29   : > { %255 = vmatpush.bf16.msra.mxu0 %v395_v1  ;;  %p550_p1 = scmp.ne.s32.totalorder %s548_s24, %s549_s25  ;;  %p554_p10 = scmp.lt.s32.totalorder %s548_s24, %s793_s3 }
  0x2a   : > { %p555_p11 = scmp.lt.s32.totalorder %s553_s30, %s549_s25 }
  0x2b   : > { %p551_p3 = pnand %p550_p1, %p715_p4 }
  0x2c   : > { %390 = vmatmul.msk.bf16.vlgmr.msra.gmra.mxu0 %vm244_vm0, %v223_v2  ;;  %p556_p12 = por %p555_p11, %p554_p10 }
  0x2d   : > { %p552_p9 = pneg %p551_p3 }
  0x2f   : > { %p557_p13 = pnand %p556_p12, %p552_p9 }
  0xa9   : > { %v257_v4 = vpop.f32.mrf.mxu0 }
  0xaa   : > { %v258_v5 = vadd.f32 %v472_v3, %v257_v4 }
  0xac   : > { %v261_v6 = vpack.c.bf16 %v258_v5, %v258_v5 }
  0xae   : > { %263 = vst.msk [vmem:[%s221_s19] sm:$0xf] %vm262_vm1, %v261_v6 }
  0xaf   : > { %560 = shalt.err (!%p557_p13)
}
  0xb0   : > { %403 = dma.vmem_to_hbm [thread:$0]  (%p715_p4), %s279_s22, 64, %s281_s18, %s265_s15  }
  0xb1   : > { %v259_v7 = vpop.f32.mrf.mxu0 }
  0xb2 PF: > { %s292_s28 = sand.u32 1, %s599_s12   ;;  %p414_p0 = pnand %p375_p6, %p723_p7 }
  0xb3   : > { %s293_s23 = scalar_lea.sflag [#allocation4], %s292_s28 }
  0xb4   : > { %p415_p2 = pneg %p414_p0 }
  0xb6   : > { %594 = dma.done.wait (%p415_p2), %s293_s23, 64  }
  0xb7   : > { %596 = vsyncadd (%p415_p2), %s293_s23, 4294967232  ;;  %s20_s17 = sadd.s32 1, %s619_s17   ;;  %s800_s12 = smov %s603_s13 }
  0xb8   : > { %p17_p5 = scmp.ge.s32.totalorder %s20_s17, 4   ;;  %s801_s13 = smov %s607_s14 }
  0xb9   : > { %s802_s14 = smov %s721_s8  ;;  %s803_s15 = smov %s615_s16 }
  0xba   : > { %s804_s16 = smov %s806_s29  ;;  %19 = sbr.rel (!%p17_p5) target bundleno = 7 (0x7), region = 81 }
  0xbf   :  { %299 = vsyncpa [#allocation3], 1 }
  0xc0   :  { %301 = vsyncpa [#allocation3 + $0x1], 1 }
  0xc1   :  { %302 = vsyncpa [#allocation6], 1 }
  0xc2   :  { %303 = vsyncpa [#allocation4], 1 }
  0xc3   :  { %305 = vsyncpa [#allocation4 + $0x1], 1 }

</bundles_post_ra>
